<compile_context>
chip_gen: v7x
topology: tpu7x:2x2x1
jax: 0.10.0
libtpu: 0.0.40
codegen_flags: <defaults>
</compile_context>

<pallas_src>
import math
from functools import partial

import jax
import jax.numpy as jnp
from jax import lax
from jax.experimental import pallas as pl
from jax.experimental.pallas import tpu as pltpu


# ----------------------------- fused Pallas kernel ----------------------------- #

def mha_fused_kernel(xq_ref, xk_ref, xv_ref, mask_ref,
                     wq_ref, bq_ref, wk_ref, bk_ref, wv_ref, bv_ref,
                     wo_ref, bo_ref, o_ref, *, heads_count):
    # Blocks (per batch element b):
    #   xq_ref: (1, Sq, D)   xk_ref/xv_ref: (1, Sk, D)   mask_ref: (1, Sq, Sk)
    #   w*_ref: (D, D) already transposed (W^T)          b*_ref: (1, D)
    #   o_ref : (1, Sq, D)
    xq = xq_ref[0]
    xk = xk_ref[0]
    xv = xv_ref[0]
    D = xq.shape[-1]
    d_k = D // heads_count
    scale = jnp.float32(1.0 / math.sqrt(d_k))

    # QKV projections -- intermediates never leave VMEM.
    # 1/sqrt(d_k) folded into q here (cheaper than scaling the SxSk score matrix).
    q = (jnp.dot(xq, wq_ref[...], preferred_element_type=jnp.float32) + bq_ref[0]) * scale
    k = jnp.dot(xk, wk_ref[...], preferred_element_type=jnp.float32) + bk_ref[0]
    v = jnp.dot(xv, wv_ref[...], preferred_element_type=jnp.float32) + bv_ref[0]

    # (Sq, Sk) boolean mask; broadcast over heads (torch mask.unsqueeze(1)).
    # Comparison done once, reused by every head.
    mask_zero = mask_ref[0] == 0
    neg_big = jnp.float32(-1e9)

    # Per-head attention (heads_count is a compile-time constant -> static unroll).
    ctx_parts = []
    for h in range(heads_count):
        sl = slice(h * d_k, (h + 1) * d_k)
        qh = q[:, sl]          # (Sq, d_k)
        kh = k[:, sl]          # (Sk, d_k)
        vh = v[:, sl]          # (Sk, d_k)

        # scores = qh @ kh^T without materializing kh.T: contract on last axes.
        s = lax.dot_general(qh, kh, (((1,), (1,)), ((), ())),
                            preferred_element_type=jnp.float32)        # (Sq, Sk)
        s = jnp.where(mask_zero, neg_big, s)

        # softmax over the key axis
        m = jnp.max(s, axis=-1, keepdims=True)
        e = jnp.exp(s - m)
        l = jnp.sum(e, axis=-1, keepdims=True)
        p = e * pl.reciprocal(l, approx=False)

        ctx_parts.append(jnp.dot(p, vh, preferred_element_type=jnp.float32))  # (Sq, d_k)

    # Concat heads -> (Sq, D) and apply the output projection; one store per block.
    ctx = jnp.concatenate(ctx_parts, axis=-1)
    out = jnp.dot(ctx, wo_ref[...], preferred_element_type=jnp.float32) + bo_ref[0]
    o_ref[0] = out.astype(o_ref.dtype)


# ---------------------------------- wrapper ------------------------------------ #

def multi_headed_attention(query, key, value, params, heads_count, mask=None):
    """Forward pass matching the PyTorch MultiHeadedAttention (eval mode).

    query: (B, Sq, D)  key/value: (B, Sk, D)  mask: (B, Sq, Sk) or None.
    params hold W^T matrices (D, D) and biases (1, D).
    """
    B, Sq, D = query.shape
    Sk = key.shape[1]
    if mask is None:
        mask = jnp.ones((B, Sq, Sk), jnp.float32)
    mask = mask.astype(jnp.float32)

    kernel = partial(mha_fused_kernel, heads_count=heads_count)
    const2d = lambda b: (0, 0)  # weights/biases: same block every step (stay resident)

    return pl.pallas_call(
        kernel,
        out_shape=jax.ShapeDtypeStruct((B, Sq, D), jnp.float32),
        grid=(B,),
        in_specs=[
            pl.BlockSpec((1, Sq, D), lambda b: (b, 0, 0)),   # query
            pl.BlockSpec((1, Sk, D), lambda b: (b, 0, 0)),   # key
            pl.BlockSpec((1, Sk, D), lambda b: (b, 0, 0)),   # value
            pl.BlockSpec((1, Sq, Sk), lambda b: (b, 0, 0)),  # mask (broadcast over heads)
            pl.BlockSpec((D, D), const2d), pl.BlockSpec((1, D), const2d),  # wq, bq
            pl.BlockSpec((D, D), const2d), pl.BlockSpec((1, D), const2d),  # wk, bk
            pl.BlockSpec((D, D), const2d), pl.BlockSpec((1, D), const2d),  # wv, bv
            pl.BlockSpec((D, D), const2d), pl.BlockSpec((1, D), const2d),  # wo, bo
        ],
        out_specs=pl.BlockSpec((1, Sq, D), lambda b: (b, 0, 0)),
        compiler_params=pltpu.CompilerParams(dimension_semantics=("parallel",)),
    )(query, key, value, mask,
      params["wq"], params["bq"], params["wk"], params["bk"],
      params["wv"], params["bv"], params["wo"], params["bo"])


# ----------------------------- pure-JAX reference ------------------------------ #

def reference_mha(query, key, value, params, heads_count, mask=None):
    B, Sq, D = query.shape
    Sk = key.shape[1]
    d_k = D // heads_count
    if mask is None:
        mask = jnp.ones((B, Sq, Sk), jnp.float32)

    def lin(x, w_t, b):
        return x @ w_t + b[0]

    q = lin(query, params["wq"], params["bq"]).reshape(B, Sq, heads_count, d_k).transpose(0, 2, 1, 3)
    k = lin(key, params["wk"], params["bk"]).reshape(B, Sk, heads_count, d_k).transpose(0, 2, 1, 3)
    v = lin(value, params["wv"], params["bv"]).reshape(B, Sk, heads_count, d_k).transpose(0, 2, 1, 3)

    scores = jnp.einsum("bhqd,bhkd->bhqk", q, k) / math.sqrt(d_k)
    scores = jnp.where(mask[:, None, :, :] == 0, -1e9, scores)
    p = jax.nn.softmax(scores, axis=-1)
    x = jnp.einsum("bhqk,bhkd->bhqd", p, v)
    x = x.transpose(0, 2, 1, 3).reshape(B, Sq, D)
    return lin(x, params["wo"], params["bo"])


# ------------------------------------ main ------------------------------------- #

if __name__ == "__main__":
    B, S, D, H = 2, 8, 32, 4
    key0 = jax.random.PRNGKey(0)
    keys = jax.random.split(key0, 12)

    # Deterministic parameter init (PyTorch nn.Linear-style uniform(-1/sqrt(D), 1/sqrt(D))).
    # Weights are stored transposed: y = x @ W^T + b, so param shape is (D_in, D_out).
    bound = 1.0 / math.sqrt(D)

    def mk_w(k):
        return jax.random.uniform(k, (D, D), jnp.float32, -bound, bound)

    def mk_b(k):
        return jax.random.uniform(k, (1, D), jnp.float32, -bound, bound)

    params = {
        "wq": mk_w(keys[0]), "bq": mk_b(keys[1]),
        "wk": mk_w(keys[2]), "bk": mk_b(keys[3]),
        "wv": mk_w(keys[4]), "bv": mk_b(keys[5]),
        "wo": mk_w(keys[6]), "bo": mk_b(keys[7]),
    }

    query = jax.random.normal(keys[8], (B, S, D), jnp.float32)
    key_in = jax.random.normal(keys[9], (B, S, D), jnp.float32)
    value = jax.random.normal(keys[10], (B, S, D), jnp.float32)
    # Causal mask to exercise the masked_fill path (1 = keep, 0 = mask).
    mask = jnp.tril(jnp.ones((S, S), jnp.float32))[None].repeat(B, axis=0)

    out = multi_headed_attention(query, key_in, value, params, H, mask=mask)
    out = jax.block_until_ready(out)

    ref = reference_mha(query, key_in, value, params, H, mask=mask)
    assert out.shape == (B, S, D)
    assert jnp.allclose(out, ref, atol=1e-4, rtol=1e-4), "Pallas result mismatch vs reference"

    print("KERNEL_OK")
</pallas_src>

<mosaic_0001>
module attributes {stable_mosaic.version = 11 : i64} {
  func.func @mha_fused_kernel(%arg0: i32, %arg1: memref<1x8x32xf32, #tpu.memory_space<vmem>>, %arg2: memref<1x8x32xf32, #tpu.memory_space<vmem>>, %arg3: memref<1x8x32xf32, #tpu.memory_space<vmem>>, %arg4: memref<1x8x8xf32, #tpu.memory_space<vmem>>, %arg5: memref<32x32xf32, #tpu.memory_space<vmem>>, %arg6: memref<1x32xf32, #tpu.memory_space<vmem>>, %arg7: memref<32x32xf32, #tpu.memory_space<vmem>>, %arg8: memref<1x32xf32, #tpu.memory_space<vmem>>, %arg9: memref<32x32xf32, #tpu.memory_space<vmem>>, %arg10: memref<1x32xf32, #tpu.memory_space<vmem>>, %arg11: memref<32x32xf32, #tpu.memory_space<vmem>>, %arg12: memref<1x32xf32, #tpu.memory_space<vmem>>, %arg13: memref<1x8x32xf32, #tpu.memory_space<vmem>>) attributes {dimension_semantics = [#tpu.dimension_semantics<parallel>], iteration_bounds = array<i64: 2>, scalar_prefetch = 0 : i64, scratch_operands = 0 : i64, tpu.core_type = #tpu.core_type<tc>, window_params = [{transform_indices = @transform_0, window_bounds = array<i64: 1, 8, 32>}, {transform_indices = @transform_1, window_bounds = array<i64: 1, 8, 32>}, {transform_indices = @transform_2, window_bounds = array<i64: 1, 8, 32>}, {transform_indices = @transform_3, window_bounds = array<i64: 1, 8, 8>}, {pipeline_mode = #tpu.pipeline_mode<synchronous>, transform_indices = @transform_4, window_bounds = array<i64: 32, 32>}, {pipeline_mode = #tpu.pipeline_mode<synchronous>, transform_indices = @transform_5, window_bounds = array<i64: 1, 32>}, {pipeline_mode = #tpu.pipeline_mode<synchronous>, transform_indices = @transform_6, window_bounds = array<i64: 32, 32>}, {pipeline_mode = #tpu.pipeline_mode<synchronous>, transform_indices = @transform_7, window_bounds = array<i64: 1, 32>}, {pipeline_mode = #tpu.pipeline_mode<synchronous>, transform_indices = @transform_8, window_bounds = array<i64: 32, 32>}, {pipeline_mode = #tpu.pipeline_mode<synchronous>, transform_indices = @transform_9, window_bounds = array<i64: 1, 32>}, {pipeline_mode = #tpu.pipeline_mode<synchronous>, transform_indices = @transform_10, window_bounds = array<i64: 32, 32>}, {pipeline_mode = #tpu.pipeline_mode<synchronous>, transform_indices = @transform_11, window_bounds = array<i64: 1, 32>}, {transform_indices = @transform_12, window_bounds = array<i64: 1, 8, 32>}]} {
    %c0 = arith.constant 0 : index
    %c0_0 = arith.constant 0 : index
    %c0_1 = arith.constant 0 : index
    %0 = vector.load %arg1[%c0, %c0_0, %c0_1] : memref<1x8x32xf32, #tpu.memory_space<vmem>>, vector<1x8x32xf32>
    %1 = vector.shape_cast %0 : vector<1x8x32xf32> to vector<8x32xf32>
    %c0_2 = arith.constant 0 : index
    %c0_3 = arith.constant 0 : index
    %c0_4 = arith.constant 0 : index
    %2 = vector.load %arg2[%c0_2, %c0_3, %c0_4] : memref<1x8x32xf32, #tpu.memory_space<vmem>>, vector<1x8x32xf32>
    %3 = vector.shape_cast %2 : vector<1x8x32xf32> to vector<8x32xf32>
    %c0_5 = arith.constant 0 : index
    %c0_6 = arith.constant 0 : index
    %c0_7 = arith.constant 0 : index
    %4 = vector.load %arg3[%c0_5, %c0_6, %c0_7] : memref<1x8x32xf32, #tpu.memory_space<vmem>>, vector<1x8x32xf32>
    %5 = vector.shape_cast %4 : vector<1x8x32xf32> to vector<8x32xf32>
    %c0_8 = arith.constant 0 : index
    %c0_9 = arith.constant 0 : index
    %6 = vector.load %arg5[%c0_8, %c0_9] : memref<32x32xf32, #tpu.memory_space<vmem>>, vector<32x32xf32>
    %cst = arith.constant dense<0.000000e+00> : vector<8x32xf32>
    %7 = tpu.matmul %1, %6, %cst {dimension_numbers = #tpu.dot_dimension_numbers<[1], [0], [0], [1], [0, 0, 1, 1], [], []>} : vector<8x32xf32>, vector<32x32xf32>, vector<8x32xf32> -> vector<8x32xf32>
    %c0_10 = arith.constant 0 : index
    %c0_11 = arith.constant 0 : index
    %8 = vector.load %arg6[%c0_10, %c0_11] : memref<1x32xf32, #tpu.memory_space<vmem>>, vector<1x32xf32>
    %9 = vector.shape_cast %8 : vector<1x32xf32> to vector<32xf32>
    %10 = vector.shape_cast %9 : vector<32xf32> to vector<1x32xf32>
    %11 = vector.broadcast %10 : vector<1x32xf32> to vector<8x32xf32>
    %12 = arith.addf %7, %11 : vector<8x32xf32>
    %cst_12 = arith.constant 0.353553385 : f32
    %13 = vector.broadcast %cst_12 : f32 to vector<8x32xf32>
    %14 = arith.mulf %12, %13 : vector<8x32xf32>
    %c0_13 = arith.constant 0 : index
    %c0_14 = arith.constant 0 : index
    %15 = vector.load %arg7[%c0_13, %c0_14] : memref<32x32xf32, #tpu.memory_space<vmem>>, vector<32x32xf32>
    %cst_15 = arith.constant dense<0.000000e+00> : vector<8x32xf32>
    %16 = tpu.matmul %3, %15, %cst_15 {dimension_numbers = #tpu.dot_dimension_numbers<[1], [0], [0], [1], [0, 0, 1, 1], [], []>} : vector<8x32xf32>, vector<32x32xf32>, vector<8x32xf32> -> vector<8x32xf32>
    %c0_16 = arith.constant 0 : index
    %c0_17 = arith.constant 0 : index
    %17 = vector.load %arg8[%c0_16, %c0_17] : memref<1x32xf32, #tpu.memory_space<vmem>>, vector<1x32xf32>
    %18 = vector.shape_cast %17 : vector<1x32xf32> to vector<32xf32>
    %19 = vector.shape_cast %18 : vector<32xf32> to vector<1x32xf32>
    %20 = vector.broadcast %19 : vector<1x32xf32> to vector<8x32xf32>
    %21 = arith.addf %16, %20 : vector<8x32xf32>
    %c0_18 = arith.constant 0 : index
    %c0_19 = arith.constant 0 : index
    %22 = vector.load %arg9[%c0_18, %c0_19] : memref<32x32xf32, #tpu.memory_space<vmem>>, vector<32x32xf32>
    %cst_20 = arith.constant dense<0.000000e+00> : vector<8x32xf32>
    %23 = tpu.matmul %5, %22, %cst_20 {dimension_numbers = #tpu.dot_dimension_numbers<[1], [0], [0], [1], [0, 0, 1, 1], [], []>} : vector<8x32xf32>, vector<32x32xf32>, vector<8x32xf32> -> vector<8x32xf32>
    %c0_21 = arith.constant 0 : index
    %c0_22 = arith.constant 0 : index
    %24 = vector.load %arg10[%c0_21, %c0_22] : memref<1x32xf32, #tpu.memory_space<vmem>>, vector<1x32xf32>
    %25 = vector.shape_cast %24 : vector<1x32xf32> to vector<32xf32>
    %26 = vector.shape_cast %25 : vector<32xf32> to vector<1x32xf32>
    %27 = vector.broadcast %26 : vector<1x32xf32> to vector<8x32xf32>
    %28 = arith.addf %23, %27 : vector<8x32xf32>
    %c0_23 = arith.constant 0 : index
    %c0_24 = arith.constant 0 : index
    %c0_25 = arith.constant 0 : index
    %29 = vector.load %arg4[%c0_23, %c0_24, %c0_25] : memref<1x8x8xf32, #tpu.memory_space<vmem>>, vector<1x8x8xf32>
    %30 = vector.shape_cast %29 : vector<1x8x8xf32> to vector<8x8xf32>
    %cst_26 = arith.constant 0.000000e+00 : f32
    %31 = vector.broadcast %cst_26 : f32 to vector<8x8xf32>
    %32 = arith.cmpf oeq, %30, %31 : vector<8x8xf32>
    %33 = vector.extract_strided_slice %14 {offsets = [0, 0], sizes = [8, 8], strides = [1, 1]} : vector<8x32xf32> to vector<8x8xf32>
    %34 = vector.extract_strided_slice %21 {offsets = [0, 0], sizes = [8, 8], strides = [1, 1]} : vector<8x32xf32> to vector<8x8xf32>
    %35 = vector.extract_strided_slice %28 {offsets = [0, 0], sizes = [8, 8], strides = [1, 1]} : vector<8x32xf32> to vector<8x8xf32>
    %cst_27 = arith.constant dense<0.000000e+00> : vector<8x8xf32>
    %36 = tpu.matmul %33, %34, %cst_27 {dimension_numbers = #tpu.dot_dimension_numbers<[1], [1], [0], [0], [0, 0, 1, 0], [], []>} : vector<8x8xf32>, vector<8x8xf32>, vector<8x8xf32> -> vector<8x8xf32>
    %cst_28 = arith.constant -1.000000e+09 : f32
    %37 = vector.broadcast %cst_28 : f32 to vector<8x8xf32>
    %38 = arith.select %32, %37, %36 : vector<8x8xi1>, vector<8x8xf32>
    %cst_29 = arith.constant dense<0xFF800000> : vector<8xf32>
    %39 = vector.multi_reduction <maximumf>, %38, %cst_29 [1] : vector<8x8xf32> to vector<8xf32>
    %40 = vector.shape_cast %39 : vector<8xf32> to vector<8x1xf32>
    %41 = vector.broadcast %40 : vector<8x1xf32> to vector<8x8xf32>
    %42 = arith.subf %38, %41 : vector<8x8xf32>
    %43 = math.exp %42 : vector<8x8xf32>
    %cst_30 = arith.constant dense<0.000000e+00> : vector<8xf32>
    %44 = vector.multi_reduction <add>, %43, %cst_30 [1] : vector<8x8xf32> to vector<8xf32>
    %45 = vector.shape_cast %44 : vector<8xf32> to vector<8x1xf32>
    %46 = tpu.reciprocal %45 : vector<8x1xf32> -> vector<8x1xf32>
    %47 = vector.broadcast %46 : vector<8x1xf32> to vector<8x8xf32>
    %48 = arith.mulf %43, %47 : vector<8x8xf32>
    %cst_31 = arith.constant dense<0.000000e+00> : vector<8x8xf32>
    %49 = tpu.matmul %48, %35, %cst_31 {dimension_numbers = #tpu.dot_dimension_numbers<[1], [0], [0], [1], [0, 0, 1, 1], [], []>} : vector<8x8xf32>, vector<8x8xf32>, vector<8x8xf32> -> vector<8x8xf32>
    %50 = vector.extract_strided_slice %14 {offsets = [0, 8], sizes = [8, 8], strides = [1, 1]} : vector<8x32xf32> to vector<8x8xf32>
    %51 = vector.extract_strided_slice %21 {offsets = [0, 8], sizes = [8, 8], strides = [1, 1]} : vector<8x32xf32> to vector<8x8xf32>
    %52 = vector.extract_strided_slice %28 {offsets = [0, 8], sizes = [8, 8], strides = [1, 1]} : vector<8x32xf32> to vector<8x8xf32>
    %cst_32 = arith.constant dense<0.000000e+00> : vector<8x8xf32>
    %53 = tpu.matmul %50, %51, %cst_32 {dimension_numbers = #tpu.dot_dimension_numbers<[1], [1], [0], [0], [0, 0, 1, 0], [], []>} : vector<8x8xf32>, vector<8x8xf32>, vector<8x8xf32> -> vector<8x8xf32>
    %cst_33 = arith.constant -1.000000e+09 : f32
    %54 = vector.broadcast %cst_33 : f32 to vector<8x8xf32>
    %55 = arith.select %32, %54, %53 : vector<8x8xi1>, vector<8x8xf32>
    %cst_34 = arith.constant dense<0xFF800000> : vector<8xf32>
    %56 = vector.multi_reduction <maximumf>, %55, %cst_34 [1] : vector<8x8xf32> to vector<8xf32>
    %57 = vector.shape_cast %56 : vector<8xf32> to vector<8x1xf32>
    %58 = vector.broadcast %57 : vector<8x1xf32> to vector<8x8xf32>
    %59 = arith.subf %55, %58 : vector<8x8xf32>
    %60 = math.exp %59 : vector<8x8xf32>
    %cst_35 = arith.constant dense<0.000000e+00> : vector<8xf32>
    %61 = vector.multi_reduction <add>, %60, %cst_35 [1] : vector<8x8xf32> to vector<8xf32>
    %62 = vector.shape_cast %61 : vector<8xf32> to vector<8x1xf32>
    %63 = tpu.reciprocal %62 : vector<8x1xf32> -> vector<8x1xf32>
    %64 = vector.broadcast %63 : vector<8x1xf32> to vector<8x8xf32>
    %65 = arith.mulf %60, %64 : vector<8x8xf32>
    %cst_36 = arith.constant dense<0.000000e+00> : vector<8x8xf32>
    %66 = tpu.matmul %65, %52, %cst_36 {dimension_numbers = #tpu.dot_dimension_numbers<[1], [0], [0], [1], [0, 0, 1, 1], [], []>} : vector<8x8xf32>, vector<8x8xf32>, vector<8x8xf32> -> vector<8x8xf32>
    %67 = vector.extract_strided_slice %14 {offsets = [0, 16], sizes = [8, 8], strides = [1, 1]} : vector<8x32xf32> to vector<8x8xf32>
    %68 = vector.extract_strided_slice %21 {offsets = [0, 16], sizes = [8, 8], strides = [1, 1]} : vector<8x32xf32> to vector<8x8xf32>
    %69 = vector.extract_strided_slice %28 {offsets = [0, 16], sizes = [8, 8], strides = [1, 1]} : vector<8x32xf32> to vector<8x8xf32>
    %cst_37 = arith.constant dense<0.000000e+00> : vector<8x8xf32>
    %70 = tpu.matmul %67, %68, %cst_37 {dimension_numbers = #tpu.dot_dimension_numbers<[1], [1], [0], [0], [0, 0, 1, 0], [], []>} : vector<8x8xf32>, vector<8x8xf32>, vector<8x8xf32> -> vector<8x8xf32>
    %cst_38 = arith.constant -1.000000e+09 : f32
    %71 = vector.broadcast %cst_38 : f32 to vector<8x8xf32>
    %72 = arith.select %32, %71, %70 : vector<8x8xi1>, vector<8x8xf32>
    %cst_39 = arith.constant dense<0xFF800000> : vector<8xf32>
    %73 = vector.multi_reduction <maximumf>, %72, %cst_39 [1] : vector<8x8xf32> to vector<8xf32>
    %74 = vector.shape_cast %73 : vector<8xf32> to vector<8x1xf32>
    %75 = vector.broadcast %74 : vector<8x1xf32> to vector<8x8xf32>
    %76 = arith.subf %72, %75 : vector<8x8xf32>
    %77 = math.exp %76 : vector<8x8xf32>
    %cst_40 = arith.constant dense<0.000000e+00> : vector<8xf32>
    %78 = vector.multi_reduction <add>, %77, %cst_40 [1] : vector<8x8xf32> to vector<8xf32>
    %79 = vector.shape_cast %78 : vector<8xf32> to vector<8x1xf32>
    %80 = tpu.reciprocal %79 : vector<8x1xf32> -> vector<8x1xf32>
    %81 = vector.broadcast %80 : vector<8x1xf32> to vector<8x8xf32>
    %82 = arith.mulf %77, %81 : vector<8x8xf32>
    %cst_41 = arith.constant dense<0.000000e+00> : vector<8x8xf32>
    %83 = tpu.matmul %82, %69, %cst_41 {dimension_numbers = #tpu.dot_dimension_numbers<[1], [0], [0], [1], [0, 0, 1, 1], [], []>} : vector<8x8xf32>, vector<8x8xf32>, vector<8x8xf32> -> vector<8x8xf32>
    %84 = vector.extract_strided_slice %14 {offsets = [0, 24], sizes = [8, 8], strides = [1, 1]} : vector<8x32xf32> to vector<8x8xf32>
    %85 = vector.extract_strided_slice %21 {offsets = [0, 24], sizes = [8, 8], strides = [1, 1]} : vector<8x32xf32> to vector<8x8xf32>
    %86 = vector.extract_strided_slice %28 {offsets = [0, 24], sizes = [8, 8], strides = [1, 1]} : vector<8x32xf32> to vector<8x8xf32>
    %cst_42 = arith.constant dense<0.000000e+00> : vector<8x8xf32>
    %87 = tpu.matmul %84, %85, %cst_42 {dimension_numbers = #tpu.dot_dimension_numbers<[1], [1], [0], [0], [0, 0, 1, 0], [], []>} : vector<8x8xf32>, vector<8x8xf32>, vector<8x8xf32> -> vector<8x8xf32>
    %cst_43 = arith.constant -1.000000e+09 : f32
    %88 = vector.broadcast %cst_43 : f32 to vector<8x8xf32>
    %89 = arith.select %32, %88, %87 : vector<8x8xi1>, vector<8x8xf32>
    %cst_44 = arith.constant dense<0xFF800000> : vector<8xf32>
    %90 = vector.multi_reduction <maximumf>, %89, %cst_44 [1] : vector<8x8xf32> to vector<8xf32>
    %91 = vector.shape_cast %90 : vector<8xf32> to vector<8x1xf32>
    %92 = vector.broadcast %91 : vector<8x1xf32> to vector<8x8xf32>
    %93 = arith.subf %89, %92 : vector<8x8xf32>
    %94 = math.exp %93 : vector<8x8xf32>
    %cst_45 = arith.constant dense<0.000000e+00> : vector<8xf32>
    %95 = vector.multi_reduction <add>, %94, %cst_45 [1] : vector<8x8xf32> to vector<8xf32>
    %96 = vector.shape_cast %95 : vector<8xf32> to vector<8x1xf32>
    %97 = tpu.reciprocal %96 : vector<8x1xf32> -> vector<8x1xf32>
    %98 = vector.broadcast %97 : vector<8x1xf32> to vector<8x8xf32>
    %99 = arith.mulf %94, %98 : vector<8x8xf32>
    %cst_46 = arith.constant dense<0.000000e+00> : vector<8x8xf32>
    %100 = tpu.matmul %99, %86, %cst_46 {dimension_numbers = #tpu.dot_dimension_numbers<[1], [0], [0], [1], [0, 0, 1, 1], [], []>} : vector<8x8xf32>, vector<8x8xf32>, vector<8x8xf32> -> vector<8x8xf32>
    %101 = tpu.concatenate %49, %66, %83, %100 in 1 : vector<8x8xf32>, vector<8x8xf32>, vector<8x8xf32>, vector<8x8xf32> -> vector<8x32xf32>
    %c0_47 = arith.constant 0 : index
    %c0_48 = arith.constant 0 : index
    %102 = vector.load %arg11[%c0_47, %c0_48] : memref<32x32xf32, #tpu.memory_space<vmem>>, vector<32x32xf32>
    %cst_49 = arith.constant dense<0.000000e+00> : vector<8x32xf32>
    %103 = tpu.matmul %101, %102, %cst_49 {dimension_numbers = #tpu.dot_dimension_numbers<[1], [0], [0], [1], [0, 0, 1, 1], [], []>} : vector<8x32xf32>, vector<32x32xf32>, vector<8x32xf32> -> vector<8x32xf32>
    %c0_50 = arith.constant 0 : index
    %c0_51 = arith.constant 0 : index
    %104 = vector.load %arg12[%c0_50, %c0_51] : memref<1x32xf32, #tpu.memory_space<vmem>>, vector<1x32xf32>
    %105 = vector.shape_cast %104 : vector<1x32xf32> to vector<32xf32>
    %106 = vector.shape_cast %105 : vector<32xf32> to vector<1x32xf32>
    %107 = vector.broadcast %106 : vector<1x32xf32> to vector<8x32xf32>
    %108 = arith.addf %103, %107 : vector<8x32xf32>
    %c0_52 = arith.constant 0 : index
    %c0_53 = arith.constant 0 : index
    %c0_54 = arith.constant 0 : index
    %109 = vector.load %arg13[%c0_52, %c0_53, %c0_54] : memref<1x8x32xf32, #tpu.memory_space<vmem>>, vector<1x8x32xf32>
    %110 = vector.shape_cast %109 : vector<1x8x32xf32> to vector<8x32xf32>
    %111 = vector.shape_cast %108 : vector<8x32xf32> to vector<1x8x32xf32>
    tpu.vector_store %arg13[%c0_52, %c0_53, %c0_54], %111 {strides = array<i32>} : memref<1x8x32xf32, #tpu.memory_space<vmem>>, vector<1x8x32xf32>,
    return
  }
  func.func @transform_0(%arg0: i32) -> (i32, i32, i32) {
    %c0_i32 = arith.constant 0 : i32
    %c0_i32_0 = arith.constant 0 : i32
    %c0_i32_1 = arith.constant 0 : i32
    return %arg0, %c0_i32, %c0_i32_0 : i32, i32, i32
  }
  func.func @transform_1(%arg0: i32) -> (i32, i32, i32) {
    %c0_i32 = arith.constant 0 : i32
    %c0_i32_0 = arith.constant 0 : i32
    %c0_i32_1 = arith.constant 0 : i32
    return %arg0, %c0_i32, %c0_i32_0 : i32, i32, i32
  }
  func.func @transform_2(%arg0: i32) -> (i32, i32, i32) {
    %c0_i32 = arith.constant 0 : i32
    %c0_i32_0 = arith.constant 0 : i32
    %c0_i32_1 = arith.constant 0 : i32
    return %arg0, %c0_i32, %c0_i32_0 : i32, i32, i32
  }
  func.func @transform_3(%arg0: i32) -> (i32, i32, i32) {
    %c0_i32 = arith.constant 0 : i32
    %c0_i32_0 = arith.constant 0 : i32
    %c0_i32_1 = arith.constant 0 : i32
    return %arg0, %c0_i32, %c0_i32_0 : i32, i32, i32
  }
  func.func @transform_4(%arg0: i32) -> (i32, i32) {
    %c0_i32 = arith.constant 0 : i32
    %c0_i32_0 = arith.constant 0 : i32
    %c0_i32_1 = arith.constant 0 : i32
    return %c0_i32, %c0_i32_0 : i32, i32
  }
  func.func @transform_5(%arg0: i32) -> (i32, i32) {
    %c0_i32 = arith.constant 0 : i32
    %c0_i32_0 = arith.constant 0 : i32
    %c0_i32_1 = arith.constant 0 : i32
    return %c0_i32, %c0_i32_0 : i32, i32
  }
  func.func @transform_6(%arg0: i32) -> (i32, i32) {
    %c0_i32 = arith.constant 0 : i32
    %c0_i32_0 = arith.constant 0 : i32
    %c0_i32_1 = arith.constant 0 : i32
    return %c0_i32, %c0_i32_0 : i32, i32
  }
  func.func @transform_7(%arg0: i32) -> (i32, i32) {
    %c0_i32 = arith.constant 0 : i32
    %c0_i32_0 = arith.constant 0 : i32
    %c0_i32_1 = arith.constant 0 : i32
    return %c0_i32, %c0_i32_0 : i32, i32
  }
  func.func @transform_8(%arg0: i32) -> (i32, i32) {
    %c0_i32 = arith.constant 0 : i32
    %c0_i32_0 = arith.constant 0 : i32
    %c0_i32_1 = arith.constant 0 : i32
    return %c0_i32, %c0_i32_0 : i32, i32
  }
  func.func @transform_9(%arg0: i32) -> (i32, i32) {
    %c0_i32 = arith.constant 0 : i32
    %c0_i32_0 = arith.constant 0 : i32
    %c0_i32_1 = arith.constant 0 : i32
    return %c0_i32, %c0_i32_0 : i32, i32
  }
  func.func @transform_10(%arg0: i32) -> (i32, i32) {
    %c0_i32 = arith.constant 0 : i32
    %c0_i32_0 = arith.constant 0 : i32
    %c0_i32_1 = arith.constant 0 : i32
    return %c0_i32, %c0_i32_0 : i32, i32
  }
  func.func @transform_11(%arg0: i32) -> (i32, i32) {
    %c0_i32 = arith.constant 0 : i32
    %c0_i32_0 = arith.constant 0 : i32
    %c0_i32_1 = arith.constant 0 : i32
    return %c0_i32, %c0_i32_0 : i32, i32
  }
  func.func @transform_12(%arg0: i32) -> (i32, i32, i32) {
    %c0_i32 = arith.constant 0 : i32
    %c0_i32_0 = arith.constant 0 : i32
    %c0_i32_1 = arith.constant 0 : i32
    return %arg0, %c0_i32, %c0_i32_0 : i32, i32, i32
  }
}

</mosaic_0001>

<bundles_post_ra>
// kernel: tpu_custom_call.1
= control target key start
LH: loop header
LB: loop body
LE: loop exit
PB: predicated region body
PF: predicated region fallthrough
CT: control target
= control target key end

     0   :  { %s2951_s0 = inlined_call_operand.hbm [shape: f32[2,8,32], index: 0, kind: input, shape index: {}]   ;;  %s2952_s1 = inlined_call_operand.hbm [shape: f32[2,8,32], index: 1, kind: input, shape index: {}]   ;;  %s2953_s2 = inlined_call_operand.hbm [shape: f32[2,8,32], index: 2, kind: input, shape index: {}]   ;;  %s2954_s3 = inlined_call_operand.hbm [shape: f32[2,8,8], index: 3, kind: input, shape index: {}]   ;;  %s2955_s4 = inlined_call_operand.hbm [shape: f32[32,32], index: 4, kind: input, shape index: {}]   ;;  %s2956_s5 = inlined_call_operand.vmem [shape: f32[1,32], index: 5, kind: input, shape index: {}]   ;;  %s2957_s6 = inlined_call_operand.hbm [shape: f32[32,32], index: 6, kind: input, shape index: {}]   ;;  %s2958_s7 = inlined_call_operand.vmem [shape: f32[1,32], index: 7, kind: input, shape index: {}]   ;;  %s2959_s8 = inlined_call_operand.hbm [shape: f32[32,32], index: 8, kind: input, shape index: {}]   ;;  %s2960_s9 = inlined_call_operand.vmem [shape: f32[1,32], index: 9, kind: input, shape index: {}]   ;;  %s2961_s10 = inlined_call_operand.vmem [shape: f32[32,32], index: 10, kind: input, shape index: {}]   ;;  %s2962_s11 = inlined_call_operand.vmem [shape: f32[1,32], index: 11, kind: input, shape index: {}]   ;;  %s2963_s12 = inlined_call_operand.hbm [shape: f32[2,8,32], index: 12, kind: output, shape index: {}]  }
   0x1   :  { %2985 = sst [smem:[#allocation26_spill]] %s2952_s1 }
   0x2   :  { %2986 = sst [smem:[#allocation27_spill]] %s2955_s4 }
   0x3   :  { %2987 = sst [smem:[#allocation28_spill]] %s2957_s6 }
   0x4   :  { %2988 = sst [smem:[#allocation29_spill]] %s2961_s10 }
   0x5   :  { %2989 = sst [smem:[#allocation30_spill]] %s2962_s11 }
   0x6   :  { %2990 = sst [smem:[#allocation31_spill]] %s2963_s12 }
   0x7   :  { %17 = vsyncpa [#allocation3], 0 }
   0x8   :  { %19 = vsyncpa [#allocation3 + $0x1], 0 }
   0x9   :  { %20 = vsyncpa [#allocation6], 0 }
   0xa   :  { %22 = vsyncpa [#allocation6 + $0x1], 0 }
   0xb   :  { %23 = vsyncpa [#allocation9], 0 }
   0xc   :  { %25 = vsyncpa [#allocation9 + $0x1], 0 }
   0xd   :  { %26 = vsyncpa [#allocation12], 0 }
   0xe   :  { %27 = vsyncpa [#allocation4], 0 }
   0xf   :  { %29 = vsyncpa [#allocation4 + $0x1], 0  ;;  %s2462_s21 = smov 0   ;;  %s2464_s22 = smov 0  }
  0x10   :  { %s2466_s23 = smov 0   ;;  %s2468_s24 = smov 0  }
  0x11 LB: > { %2991 = sst [smem:[#allocation21_spill]] %s2364_s21  ;;  %s2483_s25 = sadd.s32 4294967295, %s2376_s24   ;;  %s2376_s24 = sphi %s2468_s24, %s3032_s24   ;;  %s2372_s23 = sphi %s2466_s23, %s3036_s23   ;;  %s2368_s22 = sphi %s2464_s22, %s3035_s22   ;;  %s2364_s21 = sphi %s2462_s21, %s3034_s21  }
  0x12   : > { %s1780_s26 = sadd.s32 4294967294, %s2376_s24   ;;  %p55_p0 = scmp.ne.s32.totalorder %s2368_s22, %s2364_s21 }
  0x13   : > { %p2965_p1 = scmp.eq.s32.totalorder %s2483_s25, 0  ;;  %p331_p3 = scmp.eq.s32.totalorder %s1780_s26, 1 }
  0x14   : > { %p1781_p5 = scmp.ge.s32.totalorder %s2376_s24, 1  ;;  %p338_p7 = scmp.lt.s32.totalorder %s2376_s24, 3 }
  0x15   : > { %p2492_p4 = por %p2965_p1, %p55_p0  ;;  %p2497_p6 = por %p331_p3, %p55_p0 }
  0x16   : > { %p2502_p8 = pnand %p1781_p5, %p338_p7  ;;  %s2378_s30 = smov [#allocation10]  }
  0x17   : > { %s2992_s27 = scalar_select %p2492_p4, 1, 0 }
  0x18   : > { %s2993_s28 = scalar_select %p2497_p6, 1, 0 }
  0x19   : > { %s2995_s29 = scalar_select %p2502_p8, 1, 0 }
  0x1a   : > { %2994 = sst [smem:[#allocation22_spill]] %s2993_s28  ;;  %s350_s13 = sshll.u32 %s2378_s30, 4  ;;  %s2506_s13 = int_to_ptr.vmem [resolvable:$true] %s350_s13 }
  0x1b   : > { %p1993_p9 = pneg %p2502_p8  ;;  %s2379_s15 = smov [#allocation11]  }
  0x1c   : > { %s366_s16 = sshll.u32 %s2379_s15, 4  ;;  %s2997_s4 = sld [smem:[#allocation27_spill]]  ;;  %s2517_s16 = int_to_ptr.vmem [resolvable:$true] %s366_s16 }
  0x1d   : > { %p2513_p11 = pnand %p1993_p9, %p2965_p1 }
  0x1f   : > { %s2996_s14 = scalar_select %p2513_p11, 1, 0 }
  0x20   : > { %p2527_p13 = pneg %p2513_p11 }
  0x22   : > { %s2090_s19 = scalar_lea.hbm %s2997_s4, 512 }
  0x23   : > { %p2091_p12 = scmp.ne.s32.totalorder %s2997_s4, %s2090_s19  ;;  %p2097_p5 = scmp.lt.u32.totalorder %s2090_s19, %s2997_s4 }
  0x24   : > { %s2998_s30 = scalar_select %p2527_p13, 1, 0 }
  0x25   : > { %p2093_p0 = pnand %p2527_p13, %p2091_p12 }
  0x27   : > { %p2094_p3 = pneg %p2093_p0 }
  0x29   : > { %p2099_p7 = pnand %p2097_p5, %p2094_p3 }
  0x2b   : > { %2102 = shalt.err (!%p2099_p7)
}
  0x2c   : > { %s2103_s17 = scalar_lea.vmem %s2506_s13, 512  ;;  %p2111_p2 = scmp.lt.s32.totalorder %s2506_s13, %s2506_s13 }
  0x2d   : > { %p2104_p9 = scmp.ne.s32.totalorder %s2506_s13, %s2103_s17  ;;  %p2112_p6 = scmp.lt.s32.totalorder %s2103_s17, %s2103_s17 }
  0x2f   : > { %p2106_p10 = pnand %p2104_p9, %p2527_p13  ;;  %p2113_p12 = por %p2112_p6, %p2111_p2 }
  0x31   : > { %p2107_p1 = pneg %p2106_p10 }
  0x33   : > { %p2114_p0 = pnand %p2113_p12, %p2107_p1 }
  0x35   : > { %2117 = shalt.err (!%p2114_p0)
}
  0x36   : > { %s2970_s18 = smov 128   ;;  %s2971_s28 = smov 8  }
  0x37   : > { %1996 = dma.hbm_to_vmem [thread:$0]  (!%p2513_p11), %s2997_s4, 512, %s2506_s13, [#allocation9], %s2970_s18, %s2970_s18, %s2971_s28  }
  0x38   : > { %s2999_s6 = sld [smem:[#allocation28_spill]] }
  0x3e   : > { %s2118_s17 = scalar_lea.hbm %s2999_s6, 512 }
  0x3f   : > { %p2119_p1 = scmp.ne.s32.totalorder %s2999_s6, %s2118_s17  ;;  %p2125_p10 = scmp.lt.u32.totalorder %s2118_s17, %s2999_s6 }
  0x41   : > { %p2121_p2 = pnand %p2119_p1, %p2527_p13 }
  0x43   : > { %p2122_p6 = pneg %p2121_p2 }
  0x45   : > { %p2127_p3 = pnand %p2125_p10, %p2122_p6 }
  0x47   : > { %2130 = shalt.err (!%p2127_p3)
}
  0x48   : > { %s2131_s13 = scalar_lea.vmem %s2517_s16, 512  ;;  %p2139_p12 = scmp.lt.s32.totalorder %s2517_s16, %s2517_s16 }
  0x49   : > { %p2132_p5 = scmp.ne.s32.totalorder %s2517_s16, %s2131_s13  ;;  %p2140_p0 = scmp.lt.s32.totalorder %s2131_s13, %s2131_s13 }
  0x4b   : > { %p2134_p7 = pnand %p2132_p5, %p2527_p13  ;;  %p2141_p1 = por %p2140_p0, %p2139_p12 }
  0x4d   : > { %p2135_p9 = pneg %p2134_p7 }
  0x4f   : > { %p2142_p2 = pnand %p2141_p1, %p2135_p9 }
  0x51   : > { %2145 = shalt.err (!%p2142_p2)
}
  0x52   : > { %1999 = dma.hbm_to_vmem [thread:$0]  (!%p2513_p11), %s2999_s6, 512, %s2517_s16, [#allocation12], %s2970_s18, %s2970_s18, %s2971_s28  }
  0x53   : > { %s2578_s12 = sadd.s32 1, %s2376_s24   ;;  %s42_s21 = sadd.s32 1, %s2372_s23 }
  0x54   : > { %3000 = sst [smem:[#allocation23_spill]] %s2578_s12  ;;  %s39_s19 = ssub.s32 %s2376_s24, %s2578_s12 }
  0x55   : > { %p49_p6 = scmp.ne.s32.totalorder %s2372_s23, %s2368_s22  ;;  %p40_p10 = scmp.eq.s32.totalorder %s39_s19, 0 }
  0x56   : > { %p50_p3 = scmp.eq.s32.totalorder %s2376_s24, 0  ;;  %p3001_p5 = scmp.eq.s32.totalorder %s2483_s25, 1 }
  0x57   : > { %p2023_p9 = scmp.lt.s32.totalorder %s2376_s24, 2  ;;  %s2969_s15 = sand.u32 1, %s2372_s23  }
  0x58   : > { %p2588_p7 = por %p3001_p5, %p49_p6  ;;  %p51_p12 = por %p50_p3, %p49_p6 }
  0x59   : > { %s2594_s26 = scalar_select %p40_p10, %s2372_s23, %s42_s21  }
  0x5a   : > { %s3002_s20 = scalar_select %p2588_p7, 1, 0 }
  0x5b   : > { %3004 = sst [smem:[#allocation25_spill]] %s2594_s26  ;;  %s2599_s16 = sshll.u32 %s2969_s15, 3 }
  0x5c   : > { %3003 = sst [smem:[#allocation24_spill]] %s3002_s20  ;;  %s2602_s17 = sshll.u32 %s2376_s24, 7 }
  0x5d   : > { %p2604_p0 = pnand %p2023_p9, %p51_p12  ;;  %s2976_s10 = sand.u32 1, %s2376_s24  }
  0x5e   : > { %s3006_s1 = sld [smem:[#allocation26_spill]]  ;;  %s427_s15 = scalar_lea.vmem [#allocation5], %s2599_s16 }
  0x5f   : > { %s3005_s13 = scalar_select %p2604_p0, 1, 0 }
  0x60   : > { %s434_s18 = sshll.u32 %s427_s15, 4  ;;  %s2620_s28 = scalar_lea.sflag [#allocation6], %s2976_s10  ;;  %s2616_s18 = int_to_ptr.vmem [resolvable:$true] %s434_s18 }
  0x61   : > { %p2626_p2 = pneg %p2604_p0 }
  0x64   : > { %s2613_s21 = scalar_lea.hbm %s3006_s1, %s2602_s17  ;;  %s2151_s15 = scalar_lea.hbm %s3006_s1, 256 }
  0x65   : > { %s2146_s4 = scalar_lea.hbm %s2613_s21, 128  ;;  %p2152_p3 = scmp.lt.u32.totalorder %s2613_s21, %s3006_s1 }
  0x66   : > { %p2147_p1 = scmp.ne.s32.totalorder %s2613_s21, %s2146_s4  ;;  %p2153_p5 = scmp.lt.u32.totalorder %s2151_s15, %s2146_s4 }
  0x67   : > { %p2155_p12 = scmp.lt.u32.totalorder %s2146_s4, %s2613_s21 }
  0x68   : > { %p2149_p6 = pnand %p2626_p2, %p2147_p1  ;;  %p2154_p9 = por %p2153_p5, %p2152_p3 }
  0x6a   : > { %p2150_p10 = pneg %p2149_p6  ;;  %p2156_p7 = por %p2155_p12, %p2154_p9 }
  0x6c   : > { %p2157_p4 = pnand %p2156_p7, %p2150_p10 }
  0x6e   : > { %2160 = shalt.err (!%p2157_p4)
}
  0x6f   : > { %s2161_s10 = scalar_lea.vmem %s2616_s18, 128  ;;  %s2382_s11 = smov [#allocation5]  }
  0x70   : > { %p2162_p1 = scmp.ne.s32.totalorder %s2616_s18, %s2161_s10  ;;  %s2166_s19 = sshll.u32 %s2382_s11, 4  ;;  %s2167_s19 = int_to_ptr.vmem [resolvable:$false] %s2166_s19 }
  0x71   : > { %s2168_s12 = scalar_lea.vmem %s2167_s19, 256  ;;  %p2169_p11 = scmp.lt.s32.totalorder %s2616_s18, %s2167_s19 }
  0x72   : > { %p2164_p6 = pnand %p2162_p1, %p2626_p2  ;;  %p2170_p13 = scmp.lt.s32.totalorder %s2168_s12, %s2161_s10 }
  0x74   : > { %p2165_p8 = pneg %p2164_p6  ;;  %p2171_p3 = por %p2170_p13, %p2169_p11 }
  0x76   : > { %p2172_p5 = pnand %p2171_p3, %p2165_p8 }
  0x78   : > { %2175 = shalt.err (!%p2172_p5)
}
  0x79   : > { %2009 = dma.hbm_to_vmem [thread:$0]  (!%p2604_p0), %s2613_s21, 128, %s2616_s18, %s2620_s28  }
  0x7a   : > { %s2383_s4 = smov [#allocation13]   ;;  %s2176_s11 = scalar_lea.hbm %s2959_s8, 512 }
  0x7b   : > { %s382_s26 = sshll.u32 %s2383_s4, 4  ;;  %p2177_p4 = scmp.ne.s32.totalorder %s2959_s8, %s2176_s11  ;;  %s383_s26 = int_to_ptr.vmem [resolvable:$true] %s382_s26 }
  0x7c   : > { %p3008_p8 = scmp.ne.s32.totalorder %s2998_s30, 0  ;;  %p2183_p7 = scmp.lt.u32.totalorder %s2176_s11, %s2959_s8 }
  0x7e   : > { %p2179_p11 = pnand %p2177_p4, %p3008_p8 }
  0x80   : > { %p2180_p13 = pneg %p2179_p11 }
  0x82   : > { %p2185_p10 = pnand %p2183_p7, %p2180_p13 }
  0x84   : > { %2188 = shalt.err (!%p2185_p10)
}
  0x85   : > { %s2189_s18 = scalar_lea.vmem %s383_s26, 512  ;;  %p2197_p6 = scmp.lt.s32.totalorder %s383_s26, %s383_s26 }
  0x86   : > { %p2190_p9 = scmp.ne.s32.totalorder %s383_s26, %s2189_s18  ;;  %p2198_p3 = scmp.lt.s32.totalorder %s2189_s18, %s2189_s18 }
  0x88   : > { %p2192_p12 = pnand %p2190_p9, %p3008_p8  ;;  %p2199_p5 = por %p2198_p3, %p2197_p6 }
  0x8a   : > { %p2193_p1 = pneg %p2192_p12 }
  0x8c   : > { %p2200_p0 = pnand %p2199_p5, %p2193_p1 }
  0x8e   : > { %2203 = shalt.err (!%p2200_p0)
}
  0x8f   : > { %p3009_p4 = scmp.ne.s32.totalorder %s2996_s14, 0  ;;  %s3010_s1 = smov 8  }
  0x90   : > { %s3011_s20 = smov 128   ;;  %s2675_s11 = scalar_lea.hbm %s2951_s0, %s2602_s17 }
  0x91   : > { %2002 = dma.hbm_to_vmem [thread:$0]  (!%p3009_p4), %s2959_s8, 512, %s383_s26, [#allocation12], %s3011_s20, %s3011_s20, %s3010_s1  }
  0x92   : > { %s409_s14 = scalar_lea.vmem [#allocation2], %s2599_s16  ;;  %s3012_s10 = sand.u32 1, %s2372_s23  }
  0x93   : > { %s416_s19 = sshll.u32 %s409_s14, 4  ;;  %s406_s12 = scalar_lea.sflag [#allocation3], %s3012_s10  ;;  %s417_s19 = int_to_ptr.vmem [resolvable:$true] %s416_s19 }
  0x94   : > { %s2204_s18 = scalar_lea.hbm %s2675_s11, 128  ;;  %s2209_s20 = scalar_lea.hbm %s2951_s0, 256 }
  0x95   : > { %p2205_p0 = scmp.ne.s32.totalorder %s2675_s11, %s2204_s18  ;;  %p2210_p13 = scmp.lt.u32.totalorder %s2675_s11, %s2951_s0 }
  0x96   : > { %p2211_p7 = scmp.lt.u32.totalorder %s2209_s20, %s2204_s18  ;;  %p2213_p9 = scmp.lt.u32.totalorder %s2204_s18, %s2675_s11 }
  0x97   : > { %p2207_p8 = pnand %p2205_p0, %p2626_p2 }
  0x98   : > { %p2212_p10 = por %p2211_p7, %p2210_p13 }
  0x99   : > { %p2208_p11 = pneg %p2207_p8 }
  0x9a   : > { %p2214_p12 = por %p2213_p9, %p2212_p10 }
  0x9c   : > { %p2215_p1 = pnand %p2214_p12, %p2208_p11 }
  0x9e   : > { %2218 = shalt.err (!%p2215_p1)
}
  0x9f   : > { %s2219_s30 = scalar_lea.vmem %s417_s19, 128  ;;  %s2384_s15 = smov [#allocation2]  }
  0xa0   : > { %p2220_p6 = scmp.ne.s32.totalorder %s417_s19, %s2219_s30  ;;  %s2224_s14 = sshll.u32 %s2384_s15, 4  ;;  %s2225_s14 = int_to_ptr.vmem [resolvable:$false] %s2224_s14 }
  0xa1   : > { %s2226_s10 = scalar_lea.vmem %s2225_s14, 256  ;;  %p2227_p4 = scmp.lt.s32.totalorder %s417_s19, %s2225_s14 }
  0xa2   : > { %p2222_p3 = pnand %p2220_p6, %p2626_p2  ;;  %p2228_p0 = scmp.lt.s32.totalorder %s2226_s10, %s2219_s30 }
  0xa4   : > { %p2223_p5 = pneg %p2222_p3  ;;  %p2229_p8 = por %p2228_p0, %p2227_p4 }
  0xa6   : > { %p2230_p7 = pnand %p2229_p8, %p2223_p5 }
  0xa8   : > { %2233 = shalt.err (!%p2230_p7)
}
  0xa9   : > { %p3013_p13 = scmp.ne.s32.totalorder %s3005_s13, 0  ;;  %s2701_s1 = scalar_lea.hbm %s2953_s2, %s2602_s17 }
  0xaa   : > { %s445_s20 = scalar_lea.vmem [#allocation7], %s2599_s16  ;;  %s2234_s4 = scalar_lea.hbm %s2701_s1, 128 }
  0xab   : > { %2006 = dma.hbm_to_vmem [thread:$0]  (!%p3013_p13), %s2675_s11, 128, %s417_s19, %s406_s12  }
  0xac   : > { %s452_s21 = sshll.u32 %s445_s20, 4  ;;  %p2235_p11 = scmp.ne.s32.totalorder %s2701_s1, %s2234_s4  ;;  %s453_s21 = int_to_ptr.vmem [resolvable:$true] %s452_s21 }
  0xad   : > { %s2239_s11 = scalar_lea.hbm %s2953_s2, 256  ;;  %p2240_p12 = scmp.lt.u32.totalorder %s2701_s1, %s2953_s2 }
  0xae   : > { %p2237_p10 = pnand %p2235_p11, %p2626_p2  ;;  %p2241_p1 = scmp.lt.u32.totalorder %s2239_s11, %s2234_s4 }
  0xaf   : > { %p2243_p3 = scmp.lt.u32.totalorder %s2234_s4, %s2701_s1 }
  0xb0   : > { %p2238_p9 = pneg %p2237_p10  ;;  %p2242_p6 = por %p2241_p1, %p2240_p12 }
  0xb2   : > { %p2244_p5 = por %p2243_p3, %p2242_p6 }
  0xb4   : > { %p2245_p4 = pnand %p2244_p5, %p2238_p9 }
  0xb6   : > { %2248 = shalt.err (!%p2245_p4)
}
  0xb7   : > { %s2249_s14 = scalar_lea.vmem %s453_s21, 128  ;;  %s2385_s10 = smov [#allocation7]  }
  0xb8   : > { %p2250_p0 = scmp.ne.s32.totalorder %s453_s21, %s2249_s14  ;;  %s2254_s18 = sshll.u32 %s2385_s10, 4  ;;  %s2255_s18 = int_to_ptr.vmem [resolvable:$false] %s2254_s18 }
  0xb9   : > { %s2256_s26 = scalar_lea.vmem %s2255_s18, 256  ;;  %p2257_p11 = scmp.lt.s32.totalorder %s453_s21, %s2255_s18 }
  0xba   : > { %p2252_p8 = pnand %p2250_p0, %p2626_p2  ;;  %p2258_p10 = scmp.lt.s32.totalorder %s2256_s26, %s2249_s14 }
  0xbc   : > { %p2253_p7 = pneg %p2252_p8  ;;  %p2259_p13 = por %p2258_p10, %p2257_p11 }
  0xbe   : > { %p2260_p1 = pnand %p2259_p13, %p2253_p7 }
  0xc0   : > { %2263 = shalt.err (!%p2260_p1)
}
  0xc1   : > { %p3014_p12 = scmp.ne.s32.totalorder %s3005_s13, 0  ;;  %s2726_s30 = scalar_lea.hbm %s2954_s3, %s2602_s17 }
  0xc2   : > { %s463_s15 = scalar_lea.vmem [#allocation8], %s2599_s16  ;;  %s3015_s19 = sand.u32 1, %s2376_s24  }
  0xc3   : > { %2012 = dma.hbm_to_vmem [thread:$0]  (!%p3014_p12), %s2701_s1, 128, %s453_s21, %s2620_s28  }
  0xc4   : > { %s470_s11 = sshll.u32 %s463_s15, 4  ;;  %s460_s12 = scalar_lea.sflag [#allocation9], %s3015_s19  ;;  %s471_s11 = int_to_ptr.vmem [resolvable:$true] %s470_s11 }
  0xc5   : > { %s2264_s14 = scalar_lea.hbm %s2726_s30, 128  ;;  %s2269_s21 = scalar_lea.hbm %s2954_s3, 256 }
  0xc6   : > { %p2265_p13 = scmp.ne.s32.totalorder %s2726_s30, %s2264_s14  ;;  %p2270_p3 = scmp.lt.u32.totalorder %s2726_s30, %s2954_s3 }
  0xc7   : > { %p2271_p5 = scmp.lt.u32.totalorder %s2269_s21, %s2264_s14  ;;  %p2273_p0 = scmp.lt.u32.totalorder %s2264_s14, %s2726_s30 }
  0xc8   : > { %p2267_p9 = pnand %p2265_p13, %p2626_p2 }
  0xc9   : > { %p2272_p4 = por %p2271_p5, %p2270_p3 }
  0xca   : > { %p2268_p6 = pneg %p2267_p9 }
  0xcb   : > { %p2274_p8 = por %p2273_p0, %p2272_p4 }
  0xcd   : > { %p2275_p7 = pnand %p2274_p8, %p2268_p6 }
  0xcf   : > { %2278 = shalt.err (!%p2275_p7)
}
  0xd0   : > { %s2279_s16 = scalar_lea.vmem %s471_s11, 128  ;;  %s2386_s18 = smov [#allocation8]  }
  0xd1   : > { %p2280_p11 = scmp.ne.s32.totalorder %s471_s11, %s2279_s16  ;;  %s2284_s26 = sshll.u32 %s2386_s18, 4  ;;  %s2285_s26 = int_to_ptr.vmem [resolvable:$false] %s2284_s26 }
  0xd2   : > { %s2286_s20 = scalar_lea.vmem %s2285_s26, 256  ;;  %p2287_p13 = scmp.lt.s32.totalorder %s471_s11, %s2285_s26 }
  0xd3   : > { %p2282_p10 = pnand %p2280_p11, %p2626_p2  ;;  %p2288_p9 = scmp.lt.s32.totalorder %s2286_s20, %s2279_s16 }
  0xd5   : > { %p2283_p1 = pneg %p2282_p10  ;;  %p2289_p12 = por %p2288_p9, %p2287_p13 }
  0xd7   : > { %p2290_p3 = pnand %p2289_p12, %p2283_p1 }
  0xd9   : > { %2293 = shalt.err (!%p2290_p3)
}
  0xda   : > { %p3016_p5 = scmp.ne.s32.totalorder %s3005_s13, 0  ;;  %p3017_p6 = scmp.ne.s32.totalorder %s2995_s29, 0 }
  0xdb   : > { %s2751_s6 = sand.u32 (!%p3017_p6), 1, %s2368_s22   ;;  %p3018_p2 = scmp.ne.s32.totalorder (!%p3017_p6), %s2992_s27, 0 }
  0xdc   : > { %2015 = dma.hbm_to_vmem [thread:$0]  (!%p3016_p5), %s2726_s30, 128, %s471_s11, %s460_s12  }
  0xdd   : > { %479 = sbr.rel (%p3017_p6) target bundleno = 2148 (0x864), region = 68  ;;  %s2754_s4 = sshll.u32 (!%p3017_p6), %s2751_s6, 3 }
  0xde   : > { %s482_s15 = scalar_lea.sflag (!%p3017_p6), [#allocation3], %s2751_s6  ;;  %s485_s19 = scalar_lea.vmem (!%p3017_p6), [#allocation2], %s2754_s4 }
  0xe4   : > { %2339 = dma.done.wait (%p3018_p2), %s482_s15, 128  }
  0xe5   : > { %2341 = vsyncadd (%p3018_p2), %s482_s15, 4294967168  ;;  %s490_s29 = sand.u32 1, %s2483_s25   ;;  %s494_s30 = scalar_lea.vmem [#allocation5], %s2754_s4 }
  0xe6   : > { %s491_s13 = scalar_lea.sflag [#allocation6], %s490_s29 }
  0xe7   : > { %2343 = dma.done.wait (%p3018_p2), %s491_s13, 256  }
  0xe8   : > { %2345 = vsyncadd (%p3018_p2), %s491_s13, 4294967040  ;;  %s503_s11 = scalar_lea.vmem [#allocation7], %s2754_s4  ;;  %s509_s12 = scalar_lea.sflag [#allocation9], %s490_s29 }
  0xe9   : > { %s512_s14 = scalar_lea.vmem [#allocation8], %s2754_s4 }
  0xea   : > { %2347 = dma.done.wait (%p3018_p2), %s509_s12, 128  }
  0xeb   : > { %2349 = vsyncadd (%p3018_p2), %s509_s12, 4294967168  ;;  %p3019_p12 = scmp.eq.s32.totalorder %s2483_s25, 0 }
  0xed   : > { %2351 = dma.done.wait (%p3019_p12), [#allocation9], 512   ;;  %p3020_p4 = pmov %p3019_p12 }
  0xef   : > { %2353 = vsyncadd (%p3020_p4), [#allocation9], 4294966784  ;;  %p3021_p0 = pmov %p3020_p4 }
  0xf1   : > { %2355 = dma.done.wait (%p3021_p0), [#allocation12], 1024   ;;  %p3022_p8 = pmov %p3021_p0 }
  0xf2   : > { %v2387_v0 = vmov 0.0|0.0   ;;  %vm2388_vm0 = vmmov 0   ;;  %v2389_v1 = vmov 0.0   ;;  %v669_v2 = vld [vmem:[#allocation11] sm:$0xff]  ;;  %v670_v3 = vld [vmem:[#allocation11 + $0x8] sm:$0xff]  ;;  %v671_v7 = vld [vmem:[#allocation11 + $0x10] sm:$0xff] }
  0xf3   : > { %2357 = vsyncadd (%p3022_p8), [#allocation12], 4294966272  ;;  %1953 = vmatprep.subr.bf16.mxu1 %v2387_v0  ;;  %1947 = vmatprep.subr.bf16.mxu0 %v2387_v0  ;;  %v583_v4 = vld [vmem:[#allocation10] sm:$0xff]  ;;  %v1954_v5 = vpack.c.bf16 %v670_v3, %v669_v2  ;;  %v584_v6 = vld [vmem:[#allocation10 + $0x8] sm:$0xff]  ;;  %vm594_vm1 = vcmask 261120   ;;  %vm839_vm2 = vcmask 64512  }
  0xf4   : > { %1882 = vmatprep.mubr.msk.f32.mxu1 %vm2388_vm0, %v2389_v1  ;;  %1871 = vmatprep.mubr.msk.f32.mxu0 %vm2388_vm0, %v2389_v1  ;;  %v672_v8 = vld [vmem:[#allocation11 + $0x18] sm:$0xff]  ;;  %v1948_v9 = vpack.c.bf16 %v584_v6, %v583_v4  ;;  %v585_v10 = vld [vmem:[#allocation10 + $0x10] sm:$0xff]  ;;  %v580_v15 = vld [vmem:[%s485_s19] sm:$0xff]  ;;  %s2390_s17 = smov 120   ;;  %s2391_s10 = smov 112   ;;  %vm1513_vm4 = vcmask 130048  }
  0xf5   : > { %v586_v11 = vld [vmem:[#allocation10 + $0x18] sm:$0xff]  ;;  %1955 = vmatpush3.bf16.msra.mxu1 %v1954_v5  ;;  %v1957_v12 = vpack.c.bf16 %v672_v8, %v671_v7  ;;  %v1805_v16 = vld [vmem:[%s2958_s7] ss:$0 sm:$0xff]  ;;  %s2392_s16 = smov 104   ;;  %v754_v26 = vld [vmem:[#allocation13 + $0x8] sm:$0xff]  ;;  %s3023_s19 = sld [smem:[#allocation29_spill]] }
  0xf6   : > { %1949 = vmatpush3.bf16.msra.mxu0 %v1948_v9  ;;  %1956 = vmatprep.subr.bf16.mxu1 %v2387_v0  ;;  %v1951_v13 = vpack.c.bf16 %v586_v11, %v585_v10  ;;  %v581_v14 = vld [vmem:[%s494_s30] sm:$0xff]  ;;  %v1803_v17 = vld [vmem:[%s2956_s5] ss:$0 sm:$0xff]  ;;  %s2393_s27 = smov 8   ;;  %s2394_s28 = smov 16   ;;  %vm1515_vm5 = vcmask 195584  }
  0xf7   : > { %1950 = vmatprep.subr.bf16.mxu0 %v2387_v0  ;;  %v753_v25 = vld [vmem:[#allocation13] sm:$0xff]  ;;  %v755_v27 = vld [vmem:[#allocation13 + $0x10] sm:$0xff]  ;;  %v756_v29 = vld [vmem:[#allocation13 + $0x18] sm:$0xff]  ;;  %s2395_s1 = smov 24   ;;  %s3024_s21 = sld [smem:[#allocation24_spill]] }
  0xf8   : > { %v1960_v28 = vpack.c.bf16 %v754_v26, %v753_v25  ;;  %v1963_v30 = vpack.c.bf16 %v756_v29, %v755_v27  ;;  %v582_v31 = vld [vmem:[%s503_s11] sm:$0xff]  ;;  %v837_v32 = vld [vmem:[%s512_s14] sm:$0xff]  ;;  %s1824_s18 = sshll.u32 %s2483_s25, 7  ;;  %s579_s26 = scalar_lea.vmem [#allocation14], %s2754_s4 }
  0xf9   : > { %1958 = vmatpush3.bf16.msra.mxu1 %v1957_v12  ;;  %vm838_vm3 = vcmp.eq.f32.partialorder %v837_v32, 0.0  ;;  %v1807_v42 = vld [vmem:[%s2960_s9] ss:$0 sm:$0xff]  ;;  %s1616_s20 = sshll.u32 %s579_s26, 4  ;;  %s3026_s13 = sld [smem:[#allocation31_spill]]  ;;  %s2908_s20 = int_to_ptr.vmem [resolvable:$true] %s1616_s20 }
  0xfa   : > { %1952 = vmatpush3.bf16.msra.mxu0 %v1951_v13  ;;  %1896 = vmatprep.subr.mxu1 %v2389_v1  ;;  %s1603_s11 = scalar_lea.sflag [#allocation4], %s2751_s6  ;;  %s2294_s12 = scalar_lea.vmem %s2908_s20, 128 }
  0xfb   : > { %1959 = vmatprep.subr.bf16.mxu0 %v2387_v0  ;;  %p2295_p7 = scmp.ne.s32.totalorder %s2908_s20, %s2294_s12  ;;  %s2396_s25 = smov [#allocation14]  }
  0xfc   : > { %1883 = vmatmul.mubr.msk.f32.vlgmr.msra.gmra.mrb[0].mxu1 %vm594_vm1, %v581_v14  ;;  %s2298_s4 = sshll.u32 %s2396_s25, 4  ;;  %s2299_s4 = int_to_ptr.vmem [resolvable:$false] %s2298_s4 }
  0xfd   : > { %1872 = vmatmul.mubr.msk.f32.vlgmr.msra.gmra.mrb[0].mxu0 %vm594_vm1, %v580_v15  ;;  %1898 = vmatprep.mubr.msk.f32.mxu1 %vm2388_vm0, %v2389_v1  ;;  %p3027_p11 = scmp.ne.s32.totalorder %s3024_s21, 0  ;;  %s2300_s14 = scalar_lea.vmem %s2299_s4, 256 }
  0xfe   : > { %1893 = vmatprep.mubr.msk.f32.mxu0 %vm2388_vm0, %v2389_v1  ;;  %1961 = vmatpush3.bf16.msra.mxu0 %v1960_v28  ;;  %p2301_p13 = scmp.lt.s32.totalorder %s2908_s20, %s2299_s4  ;;  %p2302_p9 = scmp.lt.s32.totalorder %s2300_s14, %s2294_s12 }
  0xff   : > { %1962 = vmatprep.subr.bf16.mxu0 %v2387_v0  ;;  %s2906_s30 = scalar_lea.hbm %s3026_s13, %s1824_s18  ;;  %p2296_p10 = pnand %p2295_p7, %p3027_p11 }
 0x100   : > { %p2303_p3 = por %p2302_p9, %p2301_p13 }
 0x101   : > { %p2297_p1 = pneg %p2296_p10 }
 0x102   : > { %1964 = vmatpush3.bf16.msra.mxu0 %v1963_v30 }
 0x103   : > { %1916 = vmatprep.subr.mxu0 %v2389_v1  ;;  %p2304_p5 = pnand %p2303_p3, %p2297_p1 }
 0x105   : > { %1894 = vmatmul.mubr.msk.f32.vlgmr.msra.gmra.mrb[2].mxu0 %vm594_vm1, %v582_v31 }
 0x106   : > { %1918 = vmatprep.mubr.msk.f32.mxu0 %vm2388_vm0, %v2389_v1 }
 0x1cf   : > { %v749_v18 = vpop.f32.mrb[0].mxu1 }
 0x1d0   : > { %v750_v19 = vadd.f32 %v1805_v16, %v749_v18  ;;  %v664_v20 = vpop.f32.mrb[0].mxu0  ;;  %v1884_v21 = vpop.f32.mrb[1].mxu1 }
 0x1d1   : > { %v665_v22 = vadd.f32 %v1803_v17, %v664_v20  ;;  %v1873_v23 = vpop.f32.mrb[1].mxu0 }
 0x1d2   : > { %1003 = vrot.lane.b32.xlu1 %v750_v19, %s2390_s17  ;;  %1897 = vmatpush3.xpose.msk.msra.mxu1 %vm839_vm2, %v750_v19 }
 0x1d3   : > { %v668_v24 = vmul.f32 0.35355338, %v665_v22  ;;  %1901 = vmatprep.subr.mxu1 %v2389_v1 }
 0x1d5   : > { %1899 = vmatmul.mubr.msk.f32.vlgmr.msra.gmra.mrb[2].mxu1 %vm839_vm2, %v668_v24 }
 0x1d6   : > { %1001 = vrot.lane.b32.xlu1 %v668_v24, %s2390_s17  ;;  %1903 = vmatprep.mubr.msk.f32.mxu1 %vm2388_vm0, %v2389_v1 }
 0x1d8   : > { %v833_v43 = vpop.f32.mrb[2].mxu0 }
 0x1d9   : > { %v2833_v44 = vadd.f32 %v1807_v42, %v833_v43  ;;  %v1895_v45 = vpop.f32.mrb[3].mxu0 }
 0x1da   : > { %1168 = vrot.lane.b32.xlu1 %v668_v24, %s2391_s10 }
 0x1db   : > { %1902 = vmatpush3.msra.mxu1 %v2833_v44 }
 0x1dc   : > { %1906 = vmatprep.subr.mxu1 %v2389_v1 }
 0x1de   : > { %1336 = vrot.lane.b32.xlu1 %v750_v19, %s2392_s16 }
 0x1e2   : > { %1334 = vrot.lane.b32.xlu1 %v668_v24, %s2392_s16 }
 0x244   : > { %v1004_v46 = vpop.permute.xlu1 %1003 }
 0x248   : > { %v1002_v47 = vpop.permute.xlu1 %1001 }
 0x24c   : > { %v1169_v48 = vpop.permute.xlu1 %1168 }
 0x250   : > { %v1337_v51 = vpop.permute.xlu1 %1336 }
 0x254   : > { %v1335_v53 = vpop.permute.xlu1 %1334 }
 0x2a8   : > { %v912_v33 = vpop.f32.mrb[2].mxu1 }
 0x2a9   : > { %v916_v34 = vsel %vm838_vm3, -1e+09, %v912_v33  ;;  %v1900_v35 = vpop.f32.mrb[3].mxu1 }
 0x2aa   : > { %v917_v36 = vsel %vm839_vm2, %v916_v34, -inf  ;;  %v1518_v35 = vld [vmem:[%s3023_s19 + $0x8] sm:$0xff] }
 0x2ab   : > { %918 = vmax.xlane.f32.xlu0 %v917_v36 }
 0x338   : > { %v919_v37 = vpop.xlane.xlu0 %918 }
 0x339   : > { %v920_v38 = vsub.f32 %v916_v34, %v919_v37  ;;  %v1517_v34 = vld [vmem:[%s3023_s19] sm:$0xff]  ;;  %v1519_v37 = vld [vmem:[%s3023_s19 + $0x10] sm:$0xff] }
 0x33a   : > { %v1966_v36 = vpack.c.bf16 %v1518_v35, %v1517_v34 }
 0x33b   : > { %v921_v39 = vmul.f32 1.442695, %v920_v38 }
 0x33d   : > { %2074 = vpow2.f32 %v921_v39 }
 0x347   : > { %v2075_v40 = vpop.eup %2074 }
 0x348   : > { %v923_v41 = vsel %vm839_vm2, %v2075_v40, 0.0 }
 0x349   : > { %924 = vadd.xlane.f32.xlu0 %v923_v41 }
 0x35f   : > { %1170 = vrot.lane.b32.xlu0 %v750_v19, %s2391_s10 }
 0x3d6   : > { %v925_v49 = vpop.xlane.xlu0 %924 }
 0x3d7   : > { %2076 = vrcp.f32 %v925_v49 }
 0x3da   : > { %v1171_v50 = vpop.permute.xlu0 %1170 }
 0x3db   : > { %1917 = vmatpush3.xpose.msk.msra.mxu0 %vm839_vm2, %v1171_v50 }
 0x3dc   : > { %1926 = vmatprep.subr.mxu0 %v2389_v1 }
 0x3de   : > { %1919 = vmatmul.mubr.msk.f32.vlgmr.msra.gmra.mrb[4].mxu0 %vm839_vm2, %v1169_v48 }
 0x3df   : > { %1927 = vmatpush3.xpose.msk.msra.mxu0 %vm839_vm2, %v1337_v51  ;;  %1928 = vmatprep.mubr.msk.f32.mxu0 %vm2388_vm0, %v2389_v1 }
 0x3e0   : > { %1965 = vmatprep.subr.bf16.mxu0 %v2387_v0 }
 0x3e1   : > { %v2077_v52 = vpop.eup %2076 }
 0x3e2   : > { %v927_v54 = vmul.f32 %v2077_v52, %v2075_v40  ;;  %1929 = vmatmul.mubr.msk.f32.vlgmr.msra.gmra.mrb[6].mxu0 %vm839_vm2, %v1335_v53 }
 0x3e3   : > { %1944 = vmatprep.mubr.msk.f32.mxu0 %vm2388_vm0, %v2389_v1  ;;  %1967 = vmatpush3.bf16.msra.mxu0 %v1966_v36 }
 0x3e4   : > { %1904 = vmatmul.mubr.msk.f32.vlgmr.msra.gmra.mrb[4].mxu1 %vm839_vm2, %v927_v54  ;;  %1968 = vmatprep.subr.bf16.mxu0 %v2387_v0 }
 0x3e5   : > { %1907 = vmatpush3.xpose.msk.msra.mxu1 %vm839_vm2, %v1004_v46  ;;  %1908 = vmatprep.mubr.msk.f32.mxu1 %vm2388_vm0, %v2389_v1 }
 0x3e6   : > { %1911 = vmatprep.subr.mxu1 %v2389_v1 }
 0x3e8   : > { %1909 = vmatmul.mubr.msk.f32.vlgmr.msra.gmra.mrb[6].mxu1 %vm839_vm2, %v1002_v47 }
 0x3e9   : > { %1913 = vmatprep.mubr.msk.f32.mxu1 %vm2388_vm0, %v2389_v1 }
 0x4b1   : > { %v1242_v55 = vpop.f32.mrb[4].mxu0 }
 0x4b2   : > { %v1246_v56 = vsel %vm838_vm3, -1e+09, %v1242_v55  ;;  %v1920_v57 = vpop.f32.mrb[5].mxu0 }
 0x4b3   : > { %v1247_v58 = vsel %vm839_vm2, %v1246_v56, -inf }
 0x4b4   : > { %1248 = vmax.xlane.f32.xlu0 %v1247_v58 }
 0x4b5   : > { %v1408_v59 = vpop.f32.mrb[6].mxu0 }
 0x4b6   : > { %v1930_v60 = vpop.f32.mrb[7].mxu0  ;;  %v1412_v5 = vsel %vm838_vm3, -1e+09, %v1408_v59 }
 0x4b7   : > { %v2858_v61 = vpop.f32.mrb[4].mxu1  ;;  %v1413_v6 = vsel %vm839_vm2, %v1412_v5, -inf }
 0x4b8   : > { %v1905_v62 = vpop.f32.mrb[5].mxu1 }
 0x4bb   : > { %v1075_v63 = vpop.f32.mrb[6].mxu1 }
 0x4bc   : > { %v1079_v2 = vsel %vm838_vm3, -1e+09, %v1075_v63  ;;  %v1910_v3 = vpop.f32.mrb[7].mxu1 }
 0x4bd   : > { %v1080_v4 = vsel %vm839_vm2, %v1079_v2, -inf }
 0x4be   : > { %1081 = vmax.xlane.f32.xlu1 %v1080_v4 }
 0x4c2   : > { %1414 = vmax.xlane.f32.xlu1 %v1413_v6 }
 0x541   : > { %v1249_v7 = vpop.xlane.xlu0 %1248 }
 0x542   : > { %v1250_v8 = vsub.f32 %v1246_v56, %v1249_v7 }
 0x544   : > { %v1251_v9 = vmul.f32 1.442695, %v1250_v8 }
 0x546   : > { %2078 = vpow2.f32 %v1251_v9 }
 0x54b   : > { %v1082_v10 = vpop.xlane.xlu1 %1081 }
 0x54c   : > { %v1083_v18 = vsub.f32 %v1079_v2, %v1082_v10 }
 0x54e   : > { %v1084_v19 = vmul.f32 1.442695, %v1083_v18 }
 0x54f   : > { %v1415_v11 = vpop.xlane.xlu1 %1414 }
 0x550   : > { %v2079_v12 = vpop.eup %2078  ;;  %v1416_v13 = vsub.f32 %v1412_v5, %v1415_v11 }
 0x551   : > { %v1253_v14 = vsel %vm839_vm2, %v2079_v12, 0.0 }
 0x552   : > { %v1417_v15 = vmul.f32 1.442695, %v1416_v13  ;;  %1254 = vadd.xlane.f32.xlu0 %v1253_v14 }
 0x554   : > { %2080 = vpow2.f32 %v1417_v15 }
 0x555   : > { %2082 = vpow2.f32 %v1084_v19 }
 0x55e   : > { %v2081_v16 = vpop.eup %2080 }
 0x55f   : > { %v1419_v17 = vsel %vm839_vm2, %v2081_v16, 0.0  ;;  %v2083_v20 = vpop.eup %2082 }
 0x560   : > { %1420 = vadd.xlane.f32.xlu1 %v1419_v17  ;;  %v1086_v21 = vsel %vm839_vm2, %v2083_v20, 0.0 }
 0x568   : > { %1092 = vrot.lane.b32.xlu0 %v2833_v44, %s2390_s17 }
 0x571   : > { %1258 = vrot.lane.b32.xlu1 %v2833_v44, %s2391_s10 }
 0x595   : > { %1087 = vadd.xlane.f32.xlu1 %v1086_v21 }
 0x5a6   : > { %1424 = vrot.lane.b32.xlu1 %v2833_v44, %s2392_s16  ;;  %s3025_s16 = sld [smem:[#allocation30_spill]] }
 0x5ac   : > { %v1821_v50 = vld [vmem:[%s3025_s16] ss:$0 sm:$0xff] }
 0x5df   : > { %v1255_v22 = vpop.xlane.xlu0 %1254 }
 0x5e3   : > { %v1093_v23 = vpop.permute.xlu0 %1092 }
 0x5e4   : > { %1912 = vmatpush3.msra.mxu1 %v1093_v23 }
 0x5e5   : > { %1921 = vmatprep.subr.mxu1 %v2389_v1 }
 0x5ed   : > { %v1421_v24 = vpop.xlane.xlu1 %1420 }
 0x5f1   : > { %v1259_v25 = vpop.permute.xlu1 %1258 }
 0x622   : > { %v1088_v26 = vpop.xlane.xlu1 %1087 }
 0x623   : > { %2084 = vrcp.f32 %v1088_v26 }
 0x624   : > { %2086 = vrcp.f32 %v1255_v22 }
 0x625   : > { %2088 = vrcp.f32 %v1421_v24 }
 0x626   : > { %v1425_v32 = vpop.permute.xlu1 %1424 }
 0x62d   : > { %v2085_v27 = vpop.eup %2084 }
 0x62e   : > { %v1090_v28 = vmul.f32 %v2085_v27, %v2083_v20  ;;  %v2087_v29 = vpop.eup %2086 }
 0x62f   : > { %v1257_v30 = vmul.f32 %v2087_v29, %v2079_v12  ;;  %v2089_v31 = vpop.eup %2088 }
 0x630   : > { %1914 = vmatmul.mubr.msk.f32.vlgmr.msra.gmra.mrb[8].mxu1 %vm839_vm2, %v1090_v28  ;;  %v1423_v33 = vmul.f32 %v2089_v31, %v2081_v16 }
 0x631   : > { %1922 = vmatpush3.msra.mxu1 %v1259_v25  ;;  %1923 = vmatprep.mubr.msk.f32.mxu1 %vm2388_vm0, %v2389_v1 }
 0x632   : > { %1931 = vmatprep.subr.mxu1 %v2389_v1 }
 0x634   : > { %1924 = vmatmul.mubr.msk.f32.vlgmr.msra.gmra.mrb[10].mxu1 %vm839_vm2, %v1257_v30 }
 0x635   : > { %1932 = vmatpush3.msra.mxu1 %v1425_v32  ;;  %1933 = vmatprep.mubr.msk.f32.mxu1 %vm2388_vm0, %v2389_v1  ;;  %v1520_v1 = vld [vmem:[%s3023_s19 + $0x18] sm:$0xff] }
 0x636   : > { %v1969_v38 = vpack.c.bf16 %v1520_v1, %v1519_v37 }
 0x638   : > { %1934 = vmatmul.mubr.msk.f32.vlgmr.msra.gmra.mrb[12].mxu1 %vm839_vm2, %v1423_v33  ;;  %1970 = vmatpush3.bf16.msra.mxu0 %v1969_v38 }
 0x703   : > { %v1164_v39 = vpop.f32.mrb[8].mxu1 }
 0x704   : > { %1501 = vrot.lane.b32.xlu0 %v1164_v39, %s2393_s27  ;;  %v1915_v40 = vpop.f32.mrb[9].mxu1 }
 0x707   : > { %v1330_v41 = vpop.f32.mrb[10].mxu1 }
 0x708   : > { %1505 = vrot.lane.b32.xlu1 %v1330_v41, %s2394_s28  ;;  %v1925_v42 = vpop.f32.mrb[11].mxu1 }
 0x70b   : > { %v1496_v0 = vpop.f32.mrb[12].mxu1 }
 0x70c   : > { %1509 = vrot.lane.b32.xlu0 %v1496_v0, %s2395_s1  ;;  %v1935_v43 = vpop.f32.mrb[13].mxu1 }
 0x776   : > { %v1502_v44 = vpop.permute.xlu0 %1501 }
 0x777   : > { %v1512_v46 = vsel %vm839_vm2, %v2858_v61, %v1502_v44 }
 0x77a   : > { %v1506_v45 = vpop.permute.xlu1 %1505 }
 0x77b   : > { %v1514_v47 = vsel %vm1513_vm4, %v1512_v46, %v1506_v45 }
 0x77e   : > { %v1510_v48 = vpop.permute.xlu0 %1509 }
 0x77f   : > { %v1516_v49 = vsel %vm1515_vm5, %v1514_v47, %v1510_v48 }
 0x780   : > { %1945 = vmatmul.mubr.msk.f32.vlgmr.msra.gmra.mrb[8].mxu0 %vm594_vm1, %v1516_v49 }
 0x853   : > { %v1597_v51 = vpop.f32.mrb[8].mxu0 }
 0x854   : > { %v1598_v52 = vadd.f32 %v1821_v50, %v1597_v51  ;;  %v1946_v53 = vpop.f32.mrb[9].mxu0 }
 0x856   : > { %1601 = vst.msk [vmem:[%s579_s26] sm:$0xff] %vm594_vm1, %v1598_v52 }
 0x857   : > { %2307 = shalt.err (!%p2304_p5)
}
 0x858   : > { %s2308_s6 = scalar_lea.hbm %s2906_s30, 128  ;;  %s2312_s1 = scalar_lea.hbm %s3026_s13, 256 }
 0x859   : > { %p2309_p6 = scmp.ne.s32.totalorder %s2906_s30, %s2308_s6  ;;  %p2313_p4 = scmp.lt.u32.totalorder %s2906_s30, %s3026_s13 }
 0x85a   : > { %p2314_p0 = scmp.lt.u32.totalorder %s2312_s1, %s2308_s6  ;;  %p2316_p7 = scmp.lt.u32.totalorder %s2308_s6, %s2906_s30 }
 0x85b   : > { %p2310_p2 = pnand %p2309_p6, %p3027_p11 }
 0x85c   : > { %p2315_p8 = por %p2314_p0, %p2313_p4 }
 0x85d   : > { %p2311_p12 = pneg %p2310_p2 }
 0x85e   : > { %p2317_p10 = por %p2316_p7, %p2315_p8 }
 0x860   : > { %p2318_p1 = pnand %p2317_p10, %p2311_p12 }
 0x862   : > { %2321 = shalt.err (!%p2318_p1)
}
 0x863   : > { %1991 = dma.vmem_to_hbm [thread:$0]  (%p3027_p11), %s2908_s20, 128, %s2906_s30, %s1603_s11  }
 0x864 PF: > { %s3028_s16 = sld [smem:[#allocation21_spill]]  ;;  %s3029_s18 = sld [smem:[#allocation22_spill]] }
 0x865   : > { %p3031_p9 = scmp.ge.s32.totalorder %s2376_s24, 2 }
 0x86a   : > { %s1628_s26 = sand.u32 1, %s3028_s16   ;;  %p3030_p13 = scmp.ne.s32.totalorder %s3029_s18, 0 }
 0x86b   : > { %s1629_s15 = scalar_lea.sflag [#allocation4], %s1628_s26 }
 0x86c   : > { %p2017_p3 = pnand %p3031_p9, %p3030_p13 }
 0x86e   : > { %2359 = dma.done.wait (!%p2017_p3), %s1629_s15, 128  }
 0x86f   : > { %2361 = vsyncadd (!%p2017_p3), %s1629_s15, 4294967168  ;;  %s3032_s24 = sld [smem:[#allocation23_spill]]  ;;  %s3033_s29 = sld [smem:[#allocation25_spill]] }
 0x870   : > { %s3034_s21 = smov %s2368_s22  ;;  %s3035_s22 = smov %s2372_s23 }
 0x875   : > { %p32_p5 = scmp.ge.s32.totalorder %s3032_s24, 4   ;;  %s3036_s23 = smov %s3033_s29 }
 0x877   :  { %34 = sbr.rel (!%p32_p5) target bundleno = 17 (0x11), region = 162 }
 0x87e   :  { %1634 = vsyncpa [#allocation3], 1 }
 0x87f   :  { %1636 = vsyncpa [#allocation3 + $0x1], 1 }
 0x880   :  { %1637 = vsyncpa [#allocation6], 1 }
 0x881   :  { %1639 = vsyncpa [#allocation6 + $0x1], 1 }
 0x882   :  { %1640 = vsyncpa [#allocation9], 1 }
 0x883   :  { %1642 = vsyncpa [#allocation9 + $0x1], 1 }
 0x884   :  { %1643 = vsyncpa [#allocation12], 1 }
 0x885   :  { %1644 = vsyncpa [#allocation4], 1 }
 0x886   :  { %1646 = vsyncpa [#allocation4 + $0x1], 1 }

</bundles_post_ra>
